<compile_context>
chip_gen: v7x
topology: tpu7x:2x2x1
jax: 0.10.0
libtpu: 0.0.40
codegen_flags: <defaults>
</compile_context>

<pallas_src>
import functools

import jax
import jax.numpy as jnp
from jax.experimental import pallas as pl
from jax.experimental.pallas import tpu as pltpu


# ----------------------------------------------------------------------------
# Fused kernel: qkv projection + multi-head attention + fused output projection
# ----------------------------------------------------------------------------
def _fused_attention_kernel(x_ref, wqkv_ref, bqkv_ref, wout_ref, bout_ref,
                            o_ref, *, heads, scale, block_b):
    n = x_ref.shape[1]
    dim = x_ref.shape[2]
    d = dim // heads
    rows = block_b * n
    cdt = x_ref.dtype                                  # MXU compute dtype (f32 or bf16)

    # ---- qkv projection over the whole row slab (block_b*n rows) ------------
    x2d = x_ref[...].reshape(rows, dim)                # (rows, dim)
    qkv = jnp.dot(x2d, wqkv_ref[...], preferred_element_type=jnp.float32)
    qkv = qkv + bqkv_ref[...].astype(jnp.float32)      # f32 (rows, 3*dim)

    # ---- hoisted loop-invariants (JAX does not CSE broadcasts / slices) -----
    bias_out = jnp.broadcast_to(bout_ref[...].astype(jnp.float32), (n, dim))
    w_out_h = [wout_ref[h] for h in range(heads)]      # heads x (d, dim)

    # ---- per batch element in the slab, per head -----------------------------
    # Static unroll: lane offsets of the per-head q/k/v slices must be static
    # for d < 128; the acc data-dependence keeps one head's working set hot.
    for bi in range(block_b):
        r0 = bi * n
        acc = bias_out                                  # f32 (n, dim), lane-dense

        for h in range(heads):
            c = h * d
            # scale folded into q in f32, then cast to the compute dtype
            q = (qkv[r0:r0 + n, c:c + d] * scale).astype(cdt)              # (n, d)
            k = qkv[r0:r0 + n, dim + c:dim + c + d].astype(cdt)            # (n, d)
            v = qkv[r0:r0 + n, 2 * dim + c:2 * dim + c + d].astype(cdt)    # (n, d)

            # q @ k^T via transposed-contraction dot_general (no k.T relayout)
            dots = jax.lax.dot_general(
                q, k, (((1,), (1,)), ((), ())),
                preferred_element_type=jnp.float32)                         # (n, n)

            m = jnp.max(dots, axis=-1, keepdims=True)
            e = jnp.exp(dots - m)
            s = jnp.sum(e, axis=-1, keepdims=True)
            attn = (e * pl.reciprocal(s, approx=True)).astype(cdt)          # EUP divide

            head_out = jnp.dot(attn, v, preferred_element_type=jnp.float32)  # (n, d)

            # fused output projection: lane-dense (n, dim) f32 accumulate,
            # no narrow (n, d) stores, no separate merged-heads matmul
            acc = acc + jnp.dot(head_out.astype(cdt), w_out_h[h],
                                preferred_element_type=jnp.float32)

        o_ref[bi] = acc.astype(o_ref.dtype)             # lane-dense (n, dim) store


# ----------------------------------------------------------------------------
# Wrapper
# ----------------------------------------------------------------------------
def _choose_block_b(b, n, target_rows=256):
    """Largest divisor of b whose row slab fits ~target_rows MXU rows, while
    keeping >= 2 grid steps when b allows (both v7x TensorCores busy)."""
    best = 1
    for cand in range(1, b + 1):
        if b % cand == 0 and cand * n <= target_rows:
            best = cand
    if best == b and b >= 2:
        for cand in range(b // 2, 0, -1):
            if b % cand == 0:
                return cand
    return best


def attention_forward(params, x, heads=8, block_b=None):
    """x: (b, n, dim) -> (b, n, dim). Single fused pallas_call over batch slabs."""
    b, n, dim = x.shape
    assert dim % heads == 0
    d = dim // heads
    scale = dim ** (-0.5)                               # module scales by dim, not head_dim

    if block_b is None:
        block_b = _choose_block_b(b, n)
    assert b % block_b == 0, "block_b must divide the batch size"
    grid = (b // block_b,)

    w_qkv = params["w_qkv"]                             # (dim, 3*dim)
    b_qkv = params["b_qkv"].reshape(1, 3 * dim)
    w_out = params["w_nn1"].reshape(heads, d, dim)      # per-head slabs (zero-cost reshape)
    b_out = params["b_nn1"].reshape(1, dim)

    # ---- scoped-VMEM limit from the actual block footprint -------------------
    rows = block_b * n
    x_isz = jnp.dtype(x.dtype).itemsize
    w_isz = jnp.dtype(w_qkv.dtype).itemsize
    io_bytes = 2 * 2 * rows * dim * x_isz                               # x + out, double-buffered
    w_bytes = 2 * (dim * 3 * dim + 3 * dim + dim * dim + dim) * w_isz   # resident weights, 2 bufs
    tmp_bytes = 4 * (rows * 3 * dim + rows * dim + 4 * n * n)           # f32 qkv, acc, (n,n) tiles
    need = io_bytes + w_bytes + tmp_bytes
    vmem_limit = int(min(max(int(1.5 * need), 32 * 1024 * 1024), 100 * 1024 * 1024))

    kernel = functools.partial(_fused_attention_kernel,
                               heads=heads, scale=scale, block_b=block_b)

    return pl.pallas_call(
        kernel,
        out_shape=jax.ShapeDtypeStruct((b, n, dim), x.dtype),
        grid=grid,
        in_specs=[
            pl.BlockSpec((block_b, n, dim), lambda i: (i, 0, 0)),   # x (batch slab)
            pl.BlockSpec((dim, 3 * dim), lambda i: (0, 0)),         # W_qkv (resident)
            pl.BlockSpec((1, 3 * dim), lambda i: (0, 0)),           # b_qkv
            pl.BlockSpec((heads, d, dim), lambda i: (0, 0, 0)),     # W_out per-head slabs
            pl.BlockSpec((1, dim), lambda i: (0, 0)),               # b_out
        ],
        out_specs=pl.BlockSpec((block_b, n, dim), lambda i: (i, 0, 0)),
        compiler_params=pltpu.CompilerParams(
            dimension_semantics=("parallel",),                      # batch-slab axis -> megacore
            vmem_limit_bytes=vmem_limit),
    )(x, w_qkv, b_qkv, w_out, b_out)


# ----------------------------------------------------------------------------
# Parameter init (matches the PyTorch module: xavier_uniform_ weights, zero bias)
# ----------------------------------------------------------------------------
def _xavier_uniform(key, shape):
    # PyTorch xavier_uniform_ on weight of shape (out, in)
    fan_out, fan_in = shape
    bound = (6.0 / (fan_in + fan_out)) ** 0.5
    return jax.random.uniform(key, shape, jnp.float32, -bound, bound)


def init_attention_params(key, dim):
    k1, k2 = jax.random.split(key)
    w_qkv = _xavier_uniform(k1, (3 * dim, dim))   # PyTorch layout (out, in)
    w_nn1 = _xavier_uniform(k2, (dim, dim))
    return {
        "w_qkv": jnp.transpose(w_qkv),            # (dim, 3*dim) for x @ W^T
        "b_qkv": jnp.zeros((3 * dim,), jnp.float32),
        "w_nn1": jnp.transpose(w_nn1),            # (dim, dim)
        "b_nn1": jnp.zeros((dim,), jnp.float32),
    }


# ----------------------------------------------------------------------------
# Reference (pure JAX) used to sanity-check the kernel
# ----------------------------------------------------------------------------
def attention_reference(params, x, heads=8):
    b, n, dim = x.shape
    d = dim // heads
    scale = dim ** (-0.5)
    qkv = x.reshape(b * n, dim) @ params["w_qkv"] + params["b_qkv"]
    qkv = qkv.reshape(b, n, 3, heads, d).transpose(2, 0, 3, 1, 4)
    q, k, v = qkv[0], qkv[1], qkv[2]
    dots = jnp.einsum("bhid,bhjd->bhij", q, k) * scale
    attn = jax.nn.softmax(dots, axis=-1)
    out = jnp.einsum("bhij,bhjd->bhid", attn, v)
    out = out.transpose(0, 2, 1, 3).reshape(b * n, dim)
    out = out @ params["w_nn1"] + params["b_nn1"]
    return out.reshape(b, n, dim)


if __name__ == "__main__":
    key = jax.random.PRNGKey(0)
    k_param, k_x = jax.random.split(key)

    batch, seq, dim, heads = 2, 8, 32, 8           # head_dim = 4
    params = init_attention_params(k_param, dim)
    x = jax.random.normal(k_x, (batch, seq, dim), jnp.float32)

    out = attention_forward(params, x, heads=heads)
    out = jax.block_until_ready(out)

    ref = attention_reference(params, x, heads=heads)
    assert out.shape == (batch, seq, dim)
    # tolerance accounts for the approximate EUP reciprocal in the softmax
    assert jnp.allclose(out, ref, atol=5e-3, rtol=5e-3), "mismatch vs reference"

    print("KERNEL_OK")
</pallas_src>

<mosaic_0001>
module attributes {stable_mosaic.version = 11 : i64} {
  func.func @_fused_attention_kernel(%arg0: i32, %arg1: memref<1x8x32xf32, #tpu.memory_space<vmem>>, %arg2: memref<32x96xf32, #tpu.memory_space<vmem>>, %arg3: memref<1x96xf32, #tpu.memory_space<vmem>>, %arg4: memref<8x4x32xf32, #tpu.memory_space<vmem>>, %arg5: memref<1x32xf32, #tpu.memory_space<vmem>>, %arg6: memref<1x8x32xf32, #tpu.memory_space<vmem>>) attributes {dimension_semantics = [#tpu.dimension_semantics<parallel>], iteration_bounds = array<i64: 2>, scalar_prefetch = 0 : i64, scratch_operands = 0 : i64, tpu.core_type = #tpu.core_type<tc>, window_params = [{transform_indices = @transform_0, window_bounds = array<i64: 1, 8, 32>}, {pipeline_mode = #tpu.pipeline_mode<synchronous>, transform_indices = @transform_1, window_bounds = array<i64: 32, 96>}, {pipeline_mode = #tpu.pipeline_mode<synchronous>, transform_indices = @transform_2, window_bounds = array<i64: 1, 96>}, {pipeline_mode = #tpu.pipeline_mode<synchronous>, transform_indices = @transform_3, window_bounds = array<i64: 8, 4, 32>}, {pipeline_mode = #tpu.pipeline_mode<synchronous>, transform_indices = @transform_4, window_bounds = array<i64: 1, 32>}, {transform_indices = @transform_5, window_bounds = array<i64: 1, 8, 32>}]} {
    %c0 = arith.constant 0 : index
    %c0_0 = arith.constant 0 : index
    %c0_1 = arith.constant 0 : index
    %0 = vector.load %arg1[%c0, %c0_0, %c0_1] : memref<1x8x32xf32, #tpu.memory_space<vmem>>, vector<1x8x32xf32>
    %1 = vector.shape_cast %0 : vector<1x8x32xf32> to vector<8x32xf32>
    %c0_2 = arith.constant 0 : index
    %c0_3 = arith.constant 0 : index
    %2 = vector.load %arg2[%c0_2, %c0_3] : memref<32x96xf32, #tpu.memory_space<vmem>>, vector<32x96xf32>
    %cst = arith.constant dense<0.000000e+00> : vector<8x96xf32>
    %3 = tpu.matmul %1, %2, %cst {dimension_numbers = #tpu.dot_dimension_numbers<[1], [0], [0], [1], [0, 0, 1, 1], [], []>} : vector<8x32xf32>, vector<32x96xf32>, vector<8x96xf32> -> vector<8x96xf32>
    %c0_4 = arith.constant 0 : index
    %c0_5 = arith.constant 0 : index
    %4 = vector.load %arg3[%c0_4, %c0_5] : memref<1x96xf32, #tpu.memory_space<vmem>>, vector<1x96xf32>
    %5 = vector.broadcast %4 : vector<1x96xf32> to vector<8x96xf32>
    %6 = arith.addf %3, %5 : vector<8x96xf32>
    %c0_6 = arith.constant 0 : index
    %c0_7 = arith.constant 0 : index
    %7 = vector.load %arg5[%c0_6, %c0_7] : memref<1x32xf32, #tpu.memory_space<vmem>>, vector<1x32xf32>
    %8 = vector.shape_cast %7 : vector<1x32xf32> to vector<1x32xf32>
    %9 = vector.broadcast %8 : vector<1x32xf32> to vector<8x32xf32>
    %c0_8 = arith.constant 0 : index
    %c0_9 = arith.constant 0 : index
    %c0_10 = arith.constant 0 : index
    %10 = vector.load %arg4[%c0_8, %c0_9, %c0_10] : memref<8x4x32xf32, #tpu.memory_space<vmem>>, vector<1x4x32xf32>
    %11 = vector.shape_cast %10 : vector<1x4x32xf32> to vector<4x32xf32>
    %c1 = arith.constant 1 : index
    %c0_11 = arith.constant 0 : index
    %c0_12 = arith.constant 0 : index
    %12 = vector.load %arg4[%c1, %c0_11, %c0_12] : memref<8x4x32xf32, #tpu.memory_space<vmem>>, vector<1x4x32xf32>
    %13 = vector.shape_cast %12 : vector<1x4x32xf32> to vector<4x32xf32>
    %c2 = arith.constant 2 : index
    %c0_13 = arith.constant 0 : index
    %c0_14 = arith.constant 0 : index
    %14 = vector.load %arg4[%c2, %c0_13, %c0_14] : memref<8x4x32xf32, #tpu.memory_space<vmem>>, vector<1x4x32xf32>
    %15 = vector.shape_cast %14 : vector<1x4x32xf32> to vector<4x32xf32>
    %c3 = arith.constant 3 : index
    %c0_15 = arith.constant 0 : index
    %c0_16 = arith.constant 0 : index
    %16 = vector.load %arg4[%c3, %c0_15, %c0_16] : memref<8x4x32xf32, #tpu.memory_space<vmem>>, vector<1x4x32xf32>
    %17 = vector.shape_cast %16 : vector<1x4x32xf32> to vector<4x32xf32>
    %c4 = arith.constant 4 : index
    %c0_17 = arith.constant 0 : index
    %c0_18 = arith.constant 0 : index
    %18 = vector.load %arg4[%c4, %c0_17, %c0_18] : memref<8x4x32xf32, #tpu.memory_space<vmem>>, vector<1x4x32xf32>
    %19 = vector.shape_cast %18 : vector<1x4x32xf32> to vector<4x32xf32>
    %c5 = arith.constant 5 : index
    %c0_19 = arith.constant 0 : index
    %c0_20 = arith.constant 0 : index
    %20 = vector.load %arg4[%c5, %c0_19, %c0_20] : memref<8x4x32xf32, #tpu.memory_space<vmem>>, vector<1x4x32xf32>
    %21 = vector.shape_cast %20 : vector<1x4x32xf32> to vector<4x32xf32>
    %c6 = arith.constant 6 : index
    %c0_21 = arith.constant 0 : index
    %c0_22 = arith.constant 0 : index
    %22 = vector.load %arg4[%c6, %c0_21, %c0_22] : memref<8x4x32xf32, #tpu.memory_space<vmem>>, vector<1x4x32xf32>
    %23 = vector.shape_cast %22 : vector<1x4x32xf32> to vector<4x32xf32>
    %c7 = arith.constant 7 : index
    %c0_23 = arith.constant 0 : index
    %c0_24 = arith.constant 0 : index
    %24 = vector.load %arg4[%c7, %c0_23, %c0_24] : memref<8x4x32xf32, #tpu.memory_space<vmem>>, vector<1x4x32xf32>
    %25 = vector.shape_cast %24 : vector<1x4x32xf32> to vector<4x32xf32>
    %26 = vector.extract_strided_slice %6 {offsets = [0, 0], sizes = [8, 4], strides = [1, 1]} : vector<8x96xf32> to vector<8x4xf32>
    %cst_25 = arith.constant 0.176776692 : f32
    %27 = vector.broadcast %cst_25 : f32 to vector<8x4xf32>
    %28 = arith.mulf %26, %27 : vector<8x4xf32>
    %29 = vector.extract_strided_slice %6 {offsets = [0, 32], sizes = [8, 4], strides = [1, 1]} : vector<8x96xf32> to vector<8x4xf32>
    %30 = vector.extract_strided_slice %6 {offsets = [0, 64], sizes = [8, 4], strides = [1, 1]} : vector<8x96xf32> to vector<8x4xf32>
    %cst_26 = arith.constant dense<0.000000e+00> : vector<8x8xf32>
    %31 = tpu.matmul %28, %29, %cst_26 {dimension_numbers = #tpu.dot_dimension_numbers<[1], [1], [0], [0], [0, 0, 1, 0], [], []>} : vector<8x4xf32>, vector<8x4xf32>, vector<8x8xf32> -> vector<8x8xf32>
    %cst_27 = arith.constant dense<0xFF800000> : vector<8xf32>
    %32 = vector.multi_reduction <maximumf>, %31, %cst_27 [1] : vector<8x8xf32> to vector<8xf32>
    %33 = vector.shape_cast %32 : vector<8xf32> to vector<8x1xf32>
    %34 = vector.broadcast %33 : vector<8x1xf32> to vector<8x8xf32>
    %35 = arith.subf %31, %34 : vector<8x8xf32>
    %36 = math.exp %35 : vector<8x8xf32>
    %cst_28 = arith.constant dense<0.000000e+00> : vector<8xf32>
    %37 = vector.multi_reduction <add>, %36, %cst_28 [1] : vector<8x8xf32> to vector<8xf32>
    %38 = vector.shape_cast %37 : vector<8xf32> to vector<8x1xf32>
    %39 = tpu.reciprocal %38 {approx = true} : vector<8x1xf32> -> vector<8x1xf32>
    %40 = vector.broadcast %39 : vector<8x1xf32> to vector<8x8xf32>
    %41 = arith.mulf %36, %40 : vector<8x8xf32>
    %cst_29 = arith.constant dense<0.000000e+00> : vector<8x4xf32>
    %42 = tpu.matmul %41, %30, %cst_29 {dimension_numbers = #tpu.dot_dimension_numbers<[1], [0], [0], [1], [0, 0, 1, 1], [], []>} : vector<8x8xf32>, vector<8x4xf32>, vector<8x4xf32> -> vector<8x4xf32>
    %cst_30 = arith.constant dense<0.000000e+00> : vector<8x32xf32>
    %43 = tpu.matmul %42, %11, %cst_30 {dimension_numbers = #tpu.dot_dimension_numbers<[1], [0], [0], [1], [0, 0, 1, 1], [], []>} : vector<8x4xf32>, vector<4x32xf32>, vector<8x32xf32> -> vector<8x32xf32>
    %44 = arith.addf %9, %43 : vector<8x32xf32>
    %45 = vector.extract_strided_slice %6 {offsets = [0, 4], sizes = [8, 4], strides = [1, 1]} : vector<8x96xf32> to vector<8x4xf32>
    %cst_31 = arith.constant 0.176776692 : f32
    %46 = vector.broadcast %cst_31 : f32 to vector<8x4xf32>
    %47 = arith.mulf %45, %46 : vector<8x4xf32>
    %48 = vector.extract_strided_slice %6 {offsets = [0, 36], sizes = [8, 4], strides = [1, 1]} : vector<8x96xf32> to vector<8x4xf32>
    %49 = vector.extract_strided_slice %6 {offsets = [0, 68], sizes = [8, 4], strides = [1, 1]} : vector<8x96xf32> to vector<8x4xf32>
    %cst_32 = arith.constant dense<0.000000e+00> : vector<8x8xf32>
    %50 = tpu.matmul %47, %48, %cst_32 {dimension_numbers = #tpu.dot_dimension_numbers<[1], [1], [0], [0], [0, 0, 1, 0], [], []>} : vector<8x4xf32>, vector<8x4xf32>, vector<8x8xf32> -> vector<8x8xf32>
    %cst_33 = arith.constant dense<0xFF800000> : vector<8xf32>
    %51 = vector.multi_reduction <maximumf>, %50, %cst_33 [1] : vector<8x8xf32> to vector<8xf32>
    %52 = vector.shape_cast %51 : vector<8xf32> to vector<8x1xf32>
    %53 = vector.broadcast %52 : vector<8x1xf32> to vector<8x8xf32>
    %54 = arith.subf %50, %53 : vector<8x8xf32>
    %55 = math.exp %54 : vector<8x8xf32>
    %cst_34 = arith.constant dense<0.000000e+00> : vector<8xf32>
    %56 = vector.multi_reduction <add>, %55, %cst_34 [1] : vector<8x8xf32> to vector<8xf32>
    %57 = vector.shape_cast %56 : vector<8xf32> to vector<8x1xf32>
    %58 = tpu.reciprocal %57 {approx = true} : vector<8x1xf32> -> vector<8x1xf32>
    %59 = vector.broadcast %58 : vector<8x1xf32> to vector<8x8xf32>
    %60 = arith.mulf %55, %59 : vector<8x8xf32>
    %cst_35 = arith.constant dense<0.000000e+00> : vector<8x4xf32>
    %61 = tpu.matmul %60, %49, %cst_35 {dimension_numbers = #tpu.dot_dimension_numbers<[1], [0], [0], [1], [0, 0, 1, 1], [], []>} : vector<8x8xf32>, vector<8x4xf32>, vector<8x4xf32> -> vector<8x4xf32>
    %cst_36 = arith.constant dense<0.000000e+00> : vector<8x32xf32>
    %62 = tpu.matmul %61, %13, %cst_36 {dimension_numbers = #tpu.dot_dimension_numbers<[1], [0], [0], [1], [0, 0, 1, 1], [], []>} : vector<8x4xf32>, vector<4x32xf32>, vector<8x32xf32> -> vector<8x32xf32>
    %63 = arith.addf %44, %62 : vector<8x32xf32>
    %64 = vector.extract_strided_slice %6 {offsets = [0, 8], sizes = [8, 4], strides = [1, 1]} : vector<8x96xf32> to vector<8x4xf32>
    %cst_37 = arith.constant 0.176776692 : f32
    %65 = vector.broadcast %cst_37 : f32 to vector<8x4xf32>
    %66 = arith.mulf %64, %65 : vector<8x4xf32>
    %67 = vector.extract_strided_slice %6 {offsets = [0, 40], sizes = [8, 4], strides = [1, 1]} : vector<8x96xf32> to vector<8x4xf32>
    %68 = vector.extract_strided_slice %6 {offsets = [0, 72], sizes = [8, 4], strides = [1, 1]} : vector<8x96xf32> to vector<8x4xf32>
    %cst_38 = arith.constant dense<0.000000e+00> : vector<8x8xf32>
    %69 = tpu.matmul %66, %67, %cst_38 {dimension_numbers = #tpu.dot_dimension_numbers<[1], [1], [0], [0], [0, 0, 1, 0], [], []>} : vector<8x4xf32>, vector<8x4xf32>, vector<8x8xf32> -> vector<8x8xf32>
    %cst_39 = arith.constant dense<0xFF800000> : vector<8xf32>
    %70 = vector.multi_reduction <maximumf>, %69, %cst_39 [1] : vector<8x8xf32> to vector<8xf32>
    %71 = vector.shape_cast %70 : vector<8xf32> to vector<8x1xf32>
    %72 = vector.broadcast %71 : vector<8x1xf32> to vector<8x8xf32>
    %73 = arith.subf %69, %72 : vector<8x8xf32>
    %74 = math.exp %73 : vector<8x8xf32>
    %cst_40 = arith.constant dense<0.000000e+00> : vector<8xf32>
    %75 = vector.multi_reduction <add>, %74, %cst_40 [1] : vector<8x8xf32> to vector<8xf32>
    %76 = vector.shape_cast %75 : vector<8xf32> to vector<8x1xf32>
    %77 = tpu.reciprocal %76 {approx = true} : vector<8x1xf32> -> vector<8x1xf32>
    %78 = vector.broadcast %77 : vector<8x1xf32> to vector<8x8xf32>
    %79 = arith.mulf %74, %78 : vector<8x8xf32>
    %cst_41 = arith.constant dense<0.000000e+00> : vector<8x4xf32>
    %80 = tpu.matmul %79, %68, %cst_41 {dimension_numbers = #tpu.dot_dimension_numbers<[1], [0], [0], [1], [0, 0, 1, 1], [], []>} : vector<8x8xf32>, vector<8x4xf32>, vector<8x4xf32> -> vector<8x4xf32>
    %cst_42 = arith.constant dense<0.000000e+00> : vector<8x32xf32>
    %81 = tpu.matmul %80, %15, %cst_42 {dimension_numbers = #tpu.dot_dimension_numbers<[1], [0], [0], [1], [0, 0, 1, 1], [], []>} : vector<8x4xf32>, vector<4x32xf32>, vector<8x32xf32> -> vector<8x32xf32>
    %82 = arith.addf %63, %81 : vector<8x32xf32>
    %83 = vector.extract_strided_slice %6 {offsets = [0, 12], sizes = [8, 4], strides = [1, 1]} : vector<8x96xf32> to vector<8x4xf32>
    %cst_43 = arith.constant 0.176776692 : f32
    %84 = vector.broadcast %cst_43 : f32 to vector<8x4xf32>
    %85 = arith.mulf %83, %84 : vector<8x4xf32>
    %86 = vector.extract_strided_slice %6 {offsets = [0, 44], sizes = [8, 4], strides = [1, 1]} : vector<8x96xf32> to vector<8x4xf32>
    %87 = vector.extract_strided_slice %6 {offsets = [0, 76], sizes = [8, 4], strides = [1, 1]} : vector<8x96xf32> to vector<8x4xf32>
    %cst_44 = arith.constant dense<0.000000e+00> : vector<8x8xf32>
    %88 = tpu.matmul %85, %86, %cst_44 {dimension_numbers = #tpu.dot_dimension_numbers<[1], [1], [0], [0], [0, 0, 1, 0], [], []>} : vector<8x4xf32>, vector<8x4xf32>, vector<8x8xf32> -> vector<8x8xf32>
    %cst_45 = arith.constant dense<0xFF800000> : vector<8xf32>
    %89 = vector.multi_reduction <maximumf>, %88, %cst_45 [1] : vector<8x8xf32> to vector<8xf32>
    %90 = vector.shape_cast %89 : vector<8xf32> to vector<8x1xf32>
    %91 = vector.broadcast %90 : vector<8x1xf32> to vector<8x8xf32>
    %92 = arith.subf %88, %91 : vector<8x8xf32>
    %93 = math.exp %92 : vector<8x8xf32>
    %cst_46 = arith.constant dense<0.000000e+00> : vector<8xf32>
    %94 = vector.multi_reduction <add>, %93, %cst_46 [1] : vector<8x8xf32> to vector<8xf32>
    %95 = vector.shape_cast %94 : vector<8xf32> to vector<8x1xf32>
    %96 = tpu.reciprocal %95 {approx = true} : vector<8x1xf32> -> vector<8x1xf32>
    %97 = vector.broadcast %96 : vector<8x1xf32> to vector<8x8xf32>
    %98 = arith.mulf %93, %97 : vector<8x8xf32>
    %cst_47 = arith.constant dense<0.000000e+00> : vector<8x4xf32>
    %99 = tpu.matmul %98, %87, %cst_47 {dimension_numbers = #tpu.dot_dimension_numbers<[1], [0], [0], [1], [0, 0, 1, 1], [], []>} : vector<8x8xf32>, vector<8x4xf32>, vector<8x4xf32> -> vector<8x4xf32>
    %cst_48 = arith.constant dense<0.000000e+00> : vector<8x32xf32>
    %100 = tpu.matmul %99, %17, %cst_48 {dimension_numbers = #tpu.dot_dimension_numbers<[1], [0], [0], [1], [0, 0, 1, 1], [], []>} : vector<8x4xf32>, vector<4x32xf32>, vector<8x32xf32> -> vector<8x32xf32>
    %101 = arith.addf %82, %100 : vector<8x32xf32>
    %102 = vector.extract_strided_slice %6 {offsets = [0, 16], sizes = [8, 4], strides = [1, 1]} : vector<8x96xf32> to vector<8x4xf32>
    %cst_49 = arith.constant 0.176776692 : f32
    %103 = vector.broadcast %cst_49 : f32 to vector<8x4xf32>
    %104 = arith.mulf %102, %103 : vector<8x4xf32>
    %105 = vector.extract_strided_slice %6 {offsets = [0, 48], sizes = [8, 4], strides = [1, 1]} : vector<8x96xf32> to vector<8x4xf32>
    %106 = vector.extract_strided_slice %6 {offsets = [0, 80], sizes = [8, 4], strides = [1, 1]} : vector<8x96xf32> to vector<8x4xf32>
    %cst_50 = arith.constant dense<0.000000e+00> : vector<8x8xf32>
    %107 = tpu.matmul %104, %105, %cst_50 {dimension_numbers = #tpu.dot_dimension_numbers<[1], [1], [0], [0], [0, 0, 1, 0], [], []>} : vector<8x4xf32>, vector<8x4xf32>, vector<8x8xf32> -> vector<8x8xf32>
    %cst_51 = arith.constant dense<0xFF800000> : vector<8xf32>
    %108 = vector.multi_reduction <maximumf>, %107, %cst_51 [1] : vector<8x8xf32> to vector<8xf32>
    %109 = vector.shape_cast %108 : vector<8xf32> to vector<8x1xf32>
    %110 = vector.broadcast %109 : vector<8x1xf32> to vector<8x8xf32>
    %111 = arith.subf %107, %110 : vector<8x8xf32>
    %112 = math.exp %111 : vector<8x8xf32>
    %cst_52 = arith.constant dense<0.000000e+00> : vector<8xf32>
    %113 = vector.multi_reduction <add>, %112, %cst_52 [1] : vector<8x8xf32> to vector<8xf32>
    %114 = vector.shape_cast %113 : vector<8xf32> to vector<8x1xf32>
    %115 = tpu.reciprocal %114 {approx = true} : vector<8x1xf32> -> vector<8x1xf32>
    %116 = vector.broadcast %115 : vector<8x1xf32> to vector<8x8xf32>
    %117 = arith.mulf %112, %116 : vector<8x8xf32>
    %cst_53 = arith.constant dense<0.000000e+00> : vector<8x4xf32>
    %118 = tpu.matmul %117, %106, %cst_53 {dimension_numbers = #tpu.dot_dimension_numbers<[1], [0], [0], [1], [0, 0, 1, 1], [], []>} : vector<8x8xf32>, vector<8x4xf32>, vector<8x4xf32> -> vector<8x4xf32>
    %cst_54 = arith.constant dense<0.000000e+00> : vector<8x32xf32>
    %119 = tpu.matmul %118, %19, %cst_54 {dimension_numbers = #tpu.dot_dimension_numbers<[1], [0], [0], [1], [0, 0, 1, 1], [], []>} : vector<8x4xf32>, vector<4x32xf32>, vector<8x32xf32> -> vector<8x32xf32>
    %120 = arith.addf %101, %119 : vector<8x32xf32>
    %121 = vector.extract_strided_slice %6 {offsets = [0, 20], sizes = [8, 4], strides = [1, 1]} : vector<8x96xf32> to vector<8x4xf32>
    %cst_55 = arith.constant 0.176776692 : f32
    %122 = vector.broadcast %cst_55 : f32 to vector<8x4xf32>
    %123 = arith.mulf %121, %122 : vector<8x4xf32>
    %124 = vector.extract_strided_slice %6 {offsets = [0, 52], sizes = [8, 4], strides = [1, 1]} : vector<8x96xf32> to vector<8x4xf32>
    %125 = vector.extract_strided_slice %6 {offsets = [0, 84], sizes = [8, 4], strides = [1, 1]} : vector<8x96xf32> to vector<8x4xf32>
    %cst_56 = arith.constant dense<0.000000e+00> : vector<8x8xf32>
    %126 = tpu.matmul %123, %124, %cst_56 {dimension_numbers = #tpu.dot_dimension_numbers<[1], [1], [0], [0], [0, 0, 1, 0], [], []>} : vector<8x4xf32>, vector<8x4xf32>, vector<8x8xf32> -> vector<8x8xf32>
    %cst_57 = arith.constant dense<0xFF800000> : vector<8xf32>
    %127 = vector.multi_reduction <maximumf>, %126, %cst_57 [1] : vector<8x8xf32> to vector<8xf32>
    %128 = vector.shape_cast %127 : vector<8xf32> to vector<8x1xf32>
    %129 = vector.broadcast %128 : vector<8x1xf32> to vector<8x8xf32>
    %130 = arith.subf %126, %129 : vector<8x8xf32>
    %131 = math.exp %130 : vector<8x8xf32>
    %cst_58 = arith.constant dense<0.000000e+00> : vector<8xf32>
    %132 = vector.multi_reduction <add>, %131, %cst_58 [1] : vector<8x8xf32> to vector<8xf32>
    %133 = vector.shape_cast %132 : vector<8xf32> to vector<8x1xf32>
    %134 = tpu.reciprocal %133 {approx = true} : vector<8x1xf32> -> vector<8x1xf32>
    %135 = vector.broadcast %134 : vector<8x1xf32> to vector<8x8xf32>
    %136 = arith.mulf %131, %135 : vector<8x8xf32>
    %cst_59 = arith.constant dense<0.000000e+00> : vector<8x4xf32>
    %137 = tpu.matmul %136, %125, %cst_59 {dimension_numbers = #tpu.dot_dimension_numbers<[1], [0], [0], [1], [0, 0, 1, 1], [], []>} : vector<8x8xf32>, vector<8x4xf32>, vector<8x4xf32> -> vector<8x4xf32>
    %cst_60 = arith.constant dense<0.000000e+00> : vector<8x32xf32>
    %138 = tpu.matmul %137, %21, %cst_60 {dimension_numbers = #tpu.dot_dimension_numbers<[1], [0], [0], [1], [0, 0, 1, 1], [], []>} : vector<8x4xf32>, vector<4x32xf32>, vector<8x32xf32> -> vector<8x32xf32>
    %139 = arith.addf %120, %138 : vector<8x32xf32>
    %140 = vector.extract_strided_slice %6 {offsets = [0, 24], sizes = [8, 4], strides = [1, 1]} : vector<8x96xf32> to vector<8x4xf32>
    %cst_61 = arith.constant 0.176776692 : f32
    %141 = vector.broadcast %cst_61 : f32 to vector<8x4xf32>
    %142 = arith.mulf %140, %141 : vector<8x4xf32>
    %143 = vector.extract_strided_slice %6 {offsets = [0, 56], sizes = [8, 4], strides = [1, 1]} : vector<8x96xf32> to vector<8x4xf32>
    %144 = vector.extract_strided_slice %6 {offsets = [0, 88], sizes = [8, 4], strides = [1, 1]} : vector<8x96xf32> to vector<8x4xf32>
    %cst_62 = arith.constant dense<0.000000e+00> : vector<8x8xf32>
    %145 = tpu.matmul %142, %143, %cst_62 {dimension_numbers = #tpu.dot_dimension_numbers<[1], [1], [0], [0], [0, 0, 1, 0], [], []>} : vector<8x4xf32>, vector<8x4xf32>, vector<8x8xf32> -> vector<8x8xf32>
    %cst_63 = arith.constant dense<0xFF800000> : vector<8xf32>
    %146 = vector.multi_reduction <maximumf>, %145, %cst_63 [1] : vector<8x8xf32> to vector<8xf32>
    %147 = vector.shape_cast %146 : vector<8xf32> to vector<8x1xf32>
    %148 = vector.broadcast %147 : vector<8x1xf32> to vector<8x8xf32>
    %149 = arith.subf %145, %148 : vector<8x8xf32>
    %150 = math.exp %149 : vector<8x8xf32>
    %cst_64 = arith.constant dense<0.000000e+00> : vector<8xf32>
    %151 = vector.multi_reduction <add>, %150, %cst_64 [1] : vector<8x8xf32> to vector<8xf32>
    %152 = vector.shape_cast %151 : vector<8xf32> to vector<8x1xf32>
    %153 = tpu.reciprocal %152 {approx = true} : vector<8x1xf32> -> vector<8x1xf32>
    %154 = vector.broadcast %153 : vector<8x1xf32> to vector<8x8xf32>
    %155 = arith.mulf %150, %154 : vector<8x8xf32>
    %cst_65 = arith.constant dense<0.000000e+00> : vector<8x4xf32>
    %156 = tpu.matmul %155, %144, %cst_65 {dimension_numbers = #tpu.dot_dimension_numbers<[1], [0], [0], [1], [0, 0, 1, 1], [], []>} : vector<8x8xf32>, vector<8x4xf32>, vector<8x4xf32> -> vector<8x4xf32>
    %cst_66 = arith.constant dense<0.000000e+00> : vector<8x32xf32>
    %157 = tpu.matmul %156, %23, %cst_66 {dimension_numbers = #tpu.dot_dimension_numbers<[1], [0], [0], [1], [0, 0, 1, 1], [], []>} : vector<8x4xf32>, vector<4x32xf32>, vector<8x32xf32> -> vector<8x32xf32>
    %158 = arith.addf %139, %157 : vector<8x32xf32>
    %159 = vector.extract_strided_slice %6 {offsets = [0, 28], sizes = [8, 4], strides = [1, 1]} : vector<8x96xf32> to vector<8x4xf32>
    %cst_67 = arith.constant 0.176776692 : f32
    %160 = vector.broadcast %cst_67 : f32 to vector<8x4xf32>
    %161 = arith.mulf %159, %160 : vector<8x4xf32>
    %162 = vector.extract_strided_slice %6 {offsets = [0, 60], sizes = [8, 4], strides = [1, 1]} : vector<8x96xf32> to vector<8x4xf32>
    %163 = vector.extract_strided_slice %6 {offsets = [0, 92], sizes = [8, 4], strides = [1, 1]} : vector<8x96xf32> to vector<8x4xf32>
    %cst_68 = arith.constant dense<0.000000e+00> : vector<8x8xf32>
    %164 = tpu.matmul %161, %162, %cst_68 {dimension_numbers = #tpu.dot_dimension_numbers<[1], [1], [0], [0], [0, 0, 1, 0], [], []>} : vector<8x4xf32>, vector<8x4xf32>, vector<8x8xf32> -> vector<8x8xf32>
    %cst_69 = arith.constant dense<0xFF800000> : vector<8xf32>
    %165 = vector.multi_reduction <maximumf>, %164, %cst_69 [1] : vector<8x8xf32> to vector<8xf32>
    %166 = vector.shape_cast %165 : vector<8xf32> to vector<8x1xf32>
    %167 = vector.broadcast %166 : vector<8x1xf32> to vector<8x8xf32>
    %168 = arith.subf %164, %167 : vector<8x8xf32>
    %169 = math.exp %168 : vector<8x8xf32>
    %cst_70 = arith.constant dense<0.000000e+00> : vector<8xf32>
    %170 = vector.multi_reduction <add>, %169, %cst_70 [1] : vector<8x8xf32> to vector<8xf32>
    %171 = vector.shape_cast %170 : vector<8xf32> to vector<8x1xf32>
    %172 = tpu.reciprocal %171 {approx = true} : vector<8x1xf32> -> vector<8x1xf32>
    %173 = vector.broadcast %172 : vector<8x1xf32> to vector<8x8xf32>
    %174 = arith.mulf %169, %173 : vector<8x8xf32>
    %cst_71 = arith.constant dense<0.000000e+00> : vector<8x4xf32>
    %175 = tpu.matmul %174, %163, %cst_71 {dimension_numbers = #tpu.dot_dimension_numbers<[1], [0], [0], [1], [0, 0, 1, 1], [], []>} : vector<8x8xf32>, vector<8x4xf32>, vector<8x4xf32> -> vector<8x4xf32>
    %cst_72 = arith.constant dense<0.000000e+00> : vector<8x32xf32>
    %176 = tpu.matmul %175, %25, %cst_72 {dimension_numbers = #tpu.dot_dimension_numbers<[1], [0], [0], [1], [0, 0, 1, 1], [], []>} : vector<8x4xf32>, vector<4x32xf32>, vector<8x32xf32> -> vector<8x32xf32>
    %177 = arith.addf %158, %176 : vector<8x32xf32>
    %c0_73 = arith.constant 0 : index
    %c0_74 = arith.constant 0 : index
    %c0_75 = arith.constant 0 : index
    %178 = vector.load %arg6[%c0_73, %c0_74, %c0_75] : memref<1x8x32xf32, #tpu.memory_space<vmem>>, vector<1x8x32xf32>
    %179 = vector.shape_cast %178 : vector<1x8x32xf32> to vector<8x32xf32>
    %180 = vector.shape_cast %177 : vector<8x32xf32> to vector<1x8x32xf32>
    tpu.vector_store %arg6[%c0_73, %c0_74, %c0_75], %180 {strides = array<i32>} : memref<1x8x32xf32, #tpu.memory_space<vmem>>, vector<1x8x32xf32>,
    return
  }
  func.func @transform_0(%arg0: i32) -> (i32, i32, i32) {
    %c0_i32 = arith.constant 0 : i32
    %c0_i32_0 = arith.constant 0 : i32
    %c0_i32_1 = arith.constant 0 : i32
    return %arg0, %c0_i32, %c0_i32_0 : i32, i32, i32
  }
  func.func @transform_1(%arg0: i32) -> (i32, i32) {
    %c0_i32 = arith.constant 0 : i32
    %c0_i32_0 = arith.constant 0 : i32
    %c0_i32_1 = arith.constant 0 : i32
    return %c0_i32, %c0_i32_0 : i32, i32
  }
  func.func @transform_2(%arg0: i32) -> (i32, i32) {
    %c0_i32 = arith.constant 0 : i32
    %c0_i32_0 = arith.constant 0 : i32
    %c0_i32_1 = arith.constant 0 : i32
    return %c0_i32, %c0_i32_0 : i32, i32
  }
  func.func @transform_3(%arg0: i32) -> (i32, i32, i32) {
    %c0_i32 = arith.constant 0 : i32
    %c0_i32_0 = arith.constant 0 : i32
    %c0_i32_1 = arith.constant 0 : i32
    %c0_i32_2 = arith.constant 0 : i32
    return %c0_i32, %c0_i32_0, %c0_i32_1 : i32, i32, i32
  }
  func.func @transform_4(%arg0: i32) -> (i32, i32) {
    %c0_i32 = arith.constant 0 : i32
    %c0_i32_0 = arith.constant 0 : i32
    %c0_i32_1 = arith.constant 0 : i32
    return %c0_i32, %c0_i32_0 : i32, i32
  }
  func.func @transform_5(%arg0: i32) -> (i32, i32, i32) {
    %c0_i32 = arith.constant 0 : i32
    %c0_i32_0 = arith.constant 0 : i32
    %c0_i32_1 = arith.constant 0 : i32
    return %arg0, %c0_i32, %c0_i32_0 : i32, i32, i32
  }
}

</mosaic_0001>

<bundles_post_ra>
// kernel: tpu_custom_call.1
= control target key start
LH: loop header
LB: loop body
LE: loop exit
PB: predicated region body
PF: predicated region fallthrough
CT: control target
= control target key end

     0   :  { %10 = vsyncpa [#allocation3], 0  ;;  %s3452_s0 = inlined_call_operand.hbm [shape: f32[2,8,32], index: 0, kind: input, shape index: {}]   ;;  %s3453_s1 = inlined_call_operand.hbm [shape: f32[32,96], index: 1, kind: input, shape index: {}]   ;;  %s3454_s2 = inlined_call_operand.vmem [shape: f32[1,96], index: 2, kind: input, shape index: {}]   ;;  %s3455_s3 = inlined_call_operand.hbm [shape: f32[8,4,32], index: 3, kind: input, shape index: {}]   ;;  %s3456_s4 = inlined_call_operand.vmem [shape: f32[1,32], index: 4, kind: input, shape index: {}]   ;;  %s3457_s5 = inlined_call_operand.hbm [shape: f32[2,8,32], index: 5, kind: output, shape index: {}]  }
   0x1   :  { %12 = vsyncpa [#allocation3 + $0x1], 0 }
   0x2   :  { %13 = vsyncpa [#allocation6], 0 }
   0x3   :  { %14 = vsyncpa [#allocation4], 0 }
   0x4   :  { %16 = vsyncpa [#allocation4 + $0x1], 0  ;;  %s3035_s18 = smov 0   ;;  %s3037_s19 = smov 0  }
   0x5   :  { %s3039_s20 = smov 0   ;;  %s3041_s21 = smov 0  }
   0x6 LB: > { %s3056_s22 = sadd.s32 4294967295, %s2969_s21   ;;  %s2421_s23 = sadd.s32 4294967294, %s2969_s21   ;;  %s2969_s21 = sphi %s3041_s21, %s3477_s21   ;;  %s2965_s20 = sphi %s3039_s20, %s3476_s20   ;;  %s2961_s19 = sphi %s3037_s19, %s3475_s19   ;;  %s2957_s18 = sphi %s3035_s18, %s3474_s18  }
   0x7   : > { %p42_p0 = scmp.ne.s32.totalorder %s2961_s19, %s2957_s18  ;;  %p3458_p1 = scmp.eq.s32.totalorder %s3056_s22, 0 }
   0x8   : > { %p156_p3 = scmp.eq.s32.totalorder %s2421_s23, 1  ;;  %p2422_p5 = scmp.ge.s32.totalorder %s2969_s21, 1 }
   0x9   : > { %p3065_p4 = por %p3458_p1, %p42_p0  ;;  %p163_p7 = scmp.lt.s32.totalorder %s2969_s21, 3 }
   0xa   : > { %p3070_p6 = por %p156_p3, %p42_p0  ;;  %s2971_s27 = smov [#allocation5]  }
   0xb   : > { %s3461_s24 = scalar_select %p3065_p4, 1, 0 }
   0xc   : > { %s3462_s25 = scalar_select %p3070_p6, 1, 0 }
   0xd   : > { %p3075_p8 = pnand %p2422_p5, %p163_p7  ;;  %s175_s28 = sshll.u32 %s2971_s27, 4  ;;  %s3079_s28 = int_to_ptr.vmem [resolvable:$true] %s175_s28 }
   0xe   : > { %s2972_s30 = smov [#allocation7]   ;;  %s2813_s9 = scalar_lea.hbm %s3453_s1, 512 }
   0xf   : > { %p2696_p9 = pneg %p3075_p8  ;;  %s191_s6 = sshll.u32 %s2972_s30, 4  ;;  %s3090_s6 = int_to_ptr.vmem [resolvable:$true] %s191_s6 }
  0x10   : > { %p2814_p12 = scmp.ne.s32.totalorder %s3453_s1, %s2813_s9  ;;  %p2820_p5 = scmp.lt.u32.totalorder %s2813_s9, %s3453_s1 }
  0x11   : > { %p3086_p11 = pnand %p2696_p9, %p3458_p1 }
  0x13   : > { %p2815_p13 = pneg %p3086_p11 }
  0x15   : > { %p2816_p0 = pnand %p2815_p13, %p2814_p12 }
  0x17   : > { %p2817_p3 = pneg %p2816_p0 }
  0x19   : > { %p2822_p7 = pnand %p2820_p5, %p2817_p3 }
  0x1b   : > { %2825 = shalt.err (!%p2822_p7)
}
  0x1c   : > { %s2826_s14 = scalar_lea.vmem %s3079_s28, 512  ;;  %p2834_p2 = scmp.lt.s32.totalorder %s3079_s28, %s3079_s28 }
  0x1d   : > { %p2827_p9 = scmp.ne.s32.totalorder %s3079_s28, %s2826_s14  ;;  %p2835_p12 = scmp.lt.s32.totalorder %s2826_s14, %s2826_s14 }
  0x1f   : > { %p2829_p10 = pnand %p2827_p9, %p2815_p13  ;;  %p2836_p0 = por %p2835_p12, %p2834_p2 }
  0x21   : > { %p2830_p1 = pneg %p2829_p10 }
  0x23   : > { %p2837_p6 = pnand %p2836_p0, %p2830_p1 }
  0x25   : > { %2840 = shalt.err (!%p2837_p6)
}
  0x26   : > { %s2973_s15 = smov 128   ;;  %s2974_s16 = smov 8  }
  0x27   : > { %2699 = dma.hbm_to_vmem [thread:$0]  (!%p3086_p11), %s3453_s1, 512, %s3079_s28, [#allocation6], %s2973_s15, %s2973_s15, %s2974_s16  }
  0x28   : > { %s2841_s7 = scalar_lea.hbm %s3455_s3, 512 }
  0x29   : > { %p2842_p2 = scmp.ne.s32.totalorder %s3455_s3, %s2841_s7  ;;  %p2848_p10 = scmp.lt.u32.totalorder %s2841_s7, %s3455_s3 }
  0x2b   : > { %p2844_p1 = pnand %p2842_p2, %p2815_p13 }
  0x2d   : > { %p2845_p6 = pneg %p2844_p1 }
  0x2f   : > { %p2850_p3 = pnand %p2848_p10, %p2845_p6 }
  0x31   : > { %2853 = shalt.err (!%p2850_p3)
}
  0x32   : > { %s2854_s28 = scalar_lea.vmem %s3090_s6, 512  ;;  %p2862_p12 = scmp.lt.s32.totalorder %s3090_s6, %s3090_s6 }
  0x33   : > { %p2855_p5 = scmp.ne.s32.totalorder %s3090_s6, %s2854_s28  ;;  %p2863_p0 = scmp.lt.s32.totalorder %s2854_s28, %s2854_s28 }
  0x35   : > { %p2857_p7 = pnand %p2855_p5, %p2815_p13  ;;  %p2864_p2 = por %p2863_p0, %p2862_p12 }
  0x37   : > { %p2858_p9 = pneg %p2857_p7 }
  0x39   : > { %p2865_p1 = pnand %p2864_p2, %p2858_p9 }
  0x3b   : > { %2868 = shalt.err (!%p2865_p1)
}
  0x3c   : > { %s2975_s12 = smov 64   ;;  %s2976_s13 = smov 4  }
  0x3d   : > { %2702 = dma.hbm_to_vmem [thread:$0]  (!%p3086_p11), %s3455_s3, 512, %s3090_s6, [#allocation6], %s2975_s12, %s2975_s12, %s2976_s13  }
  0x3e   : > { %s3145_s16 = sadd.s32 1, %s2969_s21   ;;  %s29_s23 = sadd.s32 1, %s2965_s20 }
  0x3f   : > { %s26_s17 = ssub.s32 %s2969_s21, %s3145_s16  ;;  %p36_p6 = scmp.ne.s32.totalorder %s2965_s20, %s2961_s19 }
  0x40   : > { %p27_p13 = scmp.eq.s32.totalorder %s26_s17, 0  ;;  %p37_p10 = scmp.eq.s32.totalorder %s2969_s21, 0 }
  0x41   : > { %p3465_p5 = scmp.eq.s32.totalorder %s3056_s22, 1  ;;  %p2713_p9 = scmp.lt.s32.totalorder %s2969_s21, 2 }
  0x42   : > { %s3154_s27 = scalar_select %p27_p13, %s2965_s20, %s29_s23  }
  0x43   : > { %p38_p3 = por %p37_p10, %p36_p6  ;;  %p3158_p7 = por %p3465_p5, %p36_p6 }
  0x44   : > { %s208_s29 = sand.u32 1, %s2965_s20   ;;  %s2427_s6 = sshll.u32 %s2969_s21, 7 }
  0x45   : > { %s3466_s30 = scalar_select %p3158_p7, 1, 0 }
  0x46   : > { %s2426_s7 = sshll.u32 %s208_s29, 3  ;;  %s3168_s10 = scalar_lea.hbm %s3452_s0, %s2427_s6 }
  0x47   : > { %s212_s11 = scalar_lea.vmem [#allocation2], %s2426_s7  ;;  %p3172_p11 = pnand %p2713_p9, %p38_p3 }
  0x48   : > { %s219_s28 = sshll.u32 %s212_s11, 4  ;;  %s209_s13 = scalar_lea.sflag [#allocation3], %s208_s29  ;;  %s3170_s28 = int_to_ptr.vmem [resolvable:$true] %s219_s28 }
  0x49   : > { %s2869_s14 = scalar_lea.hbm %s3168_s10, 128  ;;  %p2871_p0 = pneg %p3172_p11 }
  0x4a   : > { %p2870_p12 = scmp.ne.s32.totalorder %s3168_s10, %s2869_s14  ;;  %s2874_s23 = scalar_lea.hbm %s3452_s0, 256 }
  0x4b   : > { %p2875_p13 = scmp.lt.u32.totalorder %s3168_s10, %s3452_s0  ;;  %p2876_p6 = scmp.lt.u32.totalorder %s2874_s23, %s2869_s14 }
  0x4c   : > { %p2872_p2 = pnand %p2871_p0, %p2870_p12  ;;  %p2878_p3 = scmp.lt.u32.totalorder %s2869_s14, %s3168_s10 }
  0x4d   : > { %p2877_p10 = por %p2876_p6, %p2875_p13 }
  0x4e   : > { %p2873_p1 = pneg %p2872_p2 }
  0x4f   : > { %p2879_p5 = por %p2878_p3, %p2877_p10 }
  0x51   : > { %p2880_p9 = pnand %p2879_p5, %p2873_p1 }
  0x53   : > { %2883 = shalt.err (!%p2880_p9)
}
  0x54   : > { %s2884_s29 = scalar_lea.vmem %s3170_s28, 128  ;;  %s2977_s8 = smov [#allocation2]  }
  0x55   : > { %p2885_p12 = scmp.ne.s32.totalorder %s3170_s28, %s2884_s29  ;;  %s2889_s9 = sshll.u32 %s2977_s8, 4  ;;  %s2890_s9 = int_to_ptr.vmem [resolvable:$false] %s2889_s9 }
  0x56   : > { %s2891_s11 = scalar_lea.vmem %s2890_s9, 256  ;;  %p2892_p4 = scmp.lt.s32.totalorder %s3170_s28, %s2890_s9 }
  0x57   : > { %p2887_p2 = pnand %p2885_p12, %p2871_p0  ;;  %p2893_p13 = scmp.lt.s32.totalorder %s2891_s11, %s2884_s29 }
  0x59   : > { %p2888_p7 = pneg %p2887_p2  ;;  %p2894_p6 = por %p2893_p13, %p2892_p4 }
  0x5b   : > { %p2895_p10 = pnand %p2894_p6, %p2888_p7 }
  0x5d   : > { %2898 = shalt.err (!%p2895_p10)
}
  0x5e   : > { %2706 = dma.hbm_to_vmem [thread:$0]  (!%p3172_p11), %s3168_s10, 128, %s3170_s28, %s209_s13  }
  0x5f   : > { %228 = sbr.rel (%p3075_p8) target bundleno = 3758 (0xeae), region = 40  ;;  %s3204_s14 = sand.u32 (!%p3075_p8), 1, %s2961_s19  }
  0x60   : > { %s2429_s15 = sshll.u32 (!%p3075_p8), %s3204_s14, 3  ;;  %s231_s17 = scalar_lea.sflag (!%p3075_p8), [#allocation3], %s3204_s14 }
  0x61   : > { %s234_s23 = scalar_lea.vmem (!%p3075_p8), [#allocation2], %s2429_s15  ;;  %p3468_p4 = scmp.ne.s32.totalorder (!%p3075_p8), %s3461_s24, 0 }
  0x66   : > { %2944 = dma.done.wait (%p3468_p4), %s231_s17, 128  }
  0x67   : > { %2946 = vsyncadd (%p3468_p4), %s231_s17, 4294967168  ;;  %p3469_p7 = scmp.eq.s32.totalorder %s3056_s22, 0 }
  0x69   : > { %2948 = dma.done.wait (%p3469_p7), [#allocation6], 1024   ;;  %p3470_p8 = pmov %p3469_p7 }
  0x6a   : > { %v2978_v0 = vmov 0.0|0.0   ;;  %vm2979_vm0 = vmmov 0   ;;  %v2980_v1 = vmov 0.0   ;;  %v270_v2 = vld [vmem:[#allocation5] sm:$0xff]  ;;  %v271_v3 = vld [vmem:[#allocation5 + $0x8] sm:$0xff]  ;;  %v272_v4 = vld [vmem:[#allocation5 + $0x10] sm:$0xff] }
  0x6b   : > { %2950 = vsyncadd (%p3470_p8), [#allocation6], 4294966272  ;;  %2664 = vmatprep.subr.bf16.mxu0 %v2978_v0  ;;  %2541 = vmatprep.mubr.msk.f32.mxu0 %vm2979_vm0, %v2980_v1  ;;  %v2665_v5 = vpack.c.bf16 %v271_v3, %v270_v2  ;;  %v273_v6 = vld [vmem:[#allocation5 + $0x18] sm:$0xff]  ;;  %vm281_vm1 = vcmask 261120   ;;  %v2433_v9 = vld [vmem:[%s3454_s2] ss:$0 sm:$0xff] }
  0x6c   : > { %2544 = vmatprep.subr.mxu1 %v2980_v1  ;;  %2546 = vmatprep.mubr.msk.f32.mxu1 %vm2979_vm0, %v2980_v1  ;;  %v2668_v7 = vpack.c.bf16 %v273_v6, %v272_v4  ;;  %v269_v8 = vld [vmem:[%s234_s23] sm:$0xff]  ;;  %s2981_s10 = smov 96   ;;  %vm381_vm2 = vcmask 31744   ;;  %vm457_vm3 = vcmask 64512   ;;  %s2982_s28 = smov 64   ;;  %vm548_vm4 = vcmask 1043456  }
  0x6d   : > { %2666 = vmatpush3.bf16.msra.mxu0 %v2665_v5  ;;  %s2983_s12 = smov 92   ;;  %s2984_s13 = smov 124   ;;  %v362_v27 = vld [vmem:[#allocation7] sm:$0xf] }
  0x6e   : > { %2667 = vmatprep.subr.bf16.mxu0 %v2978_v0  ;;  %s2985_s7 = smov 88   ;;  %s2986_s6 = smov 120  }
  0x6f   : > { %s2987_s29 = smov 56   ;;  %s2988_s8 = smov 84  }
  0x70   : > { %s2989_s9 = smov 116   ;;  %s2990_s11 = smov 80  }
  0x71   : > { %2669 = vmatpush3.bf16.msra.mxu0 %v2668_v7  ;;  %s2991_s17 = smov 112   ;;  %s2992_s23 = smov 76  }
  0x72   : > { %2564 = vmatprep.subr.mxu0 %v2980_v1  ;;  %s2993_s24 = smov 48   ;;  %s2994_s26 = smov 72  }
  0x73   : > { %p3471_p0 = scmp.ne.s32.totalorder %s3466_s30, 0 }
  0x74   : > { %2542 = vmatmul.mubr.msk.f32.vlgmr.msra.gmra.mrb[0].mxu0 %vm281_vm1, %v269_v8 }
  0x75   : > { %2566 = vmatprep.mubr.msk.f32.mxu0 %vm2979_vm0, %v2980_v1 }
 0x147   : > { %v351_v10 = vpop.f32.mrb[0].mxu0 }
 0x148   : > { %v3230_v11 = vadd.f32 %v2433_v9, %v351_v10  ;;  %v2543_v12 = vpop.f32.mrb[1].mxu0 }
 0x14a   : > { %379 = vrot.lane.b32.xlu0 %v3230_v11, %s2981_s10  ;;  %v3235_v14 = vmul.f32 0.17677669, %v3230_v11  ;;  %s2995_s10 = smov 60  }
 0x1bc   : > { %v380_v13 = vpop.permute.xlu0 %379 }
 0x1bd   : > { %2545 = vmatpush3.xpose.msk.msra.mxu1 %vm381_vm2, %v380_v13 }
 0x1be   : > { %2549 = vmatprep.subr.mxu1 %v2980_v1 }
 0x1c0   : > { %2547 = vmatmul.mubr.msk.f32.vlgmr.msra.gmra.mrb[0].mxu1 %vm381_vm2, %v3235_v14 }
 0x1c1   : > { %2551 = vmatprep.mubr.msk.f32.mxu1 %vm2979_vm0, %v2980_v1 }
 0x293   : > { %v453_v15 = vpop.f32.mrb[0].mxu1 }
 0x294   : > { %v2548_v16 = vpop.f32.mrb[1].mxu1  ;;  %v458_v17 = vsel %vm457_vm3, %v453_v15, -inf }
 0x295   : > { %459 = vmax.xlane.f32.xlu0 %v458_v17 }
 0x322   : > { %v460_v18 = vpop.xlane.xlu0 %459 }
 0x323   : > { %v461_v19 = vsub.f32 %v453_v15, %v460_v18 }
 0x325   : > { %v462_v20 = vmul.f32 1.442695, %v461_v19 }
 0x327   : > { %2781 = vpow2.f32 %v462_v20 }
 0x331   : > { %v2782_v21 = vpop.eup %2781 }
 0x332   : > { %v464_v22 = vsel %vm457_vm3, %v2782_v21, 0.0 }
 0x333   : > { %465 = vadd.xlane.f32.xlu1 %v464_v22 }
 0x344   : > { %469 = vrot.lane.b32.xlu1 %v3230_v11, %s2982_s28  ;;  %s2996_s28 = smov 108  }
 0x348   : > { %625 = vrot.lane.b32.xlu1 %v3230_v11, %s2983_s12  ;;  %s2997_s12 = smov 104  }
 0x34c   : > { %623 = vrot.lane.b32.xlu1 %v3235_v14, %s2984_s13  ;;  %s2998_s13 = smov 52  }
 0x350   : > { %867 = vrot.lane.b32.xlu1 %v3230_v11, %s2985_s7  ;;  %s2999_s7 = smov 68  }
 0x354   : > { %865 = vrot.lane.b32.xlu1 %v3235_v14, %s2986_s6  ;;  %s3000_s6 = smov 100  }
 0x3c0   : > { %v466_v23 = vpop.xlane.xlu1 %465 }
 0x3c1   : > { %2783 = vrcp.f32 %v466_v23 }
 0x3c4   : > { %v470_v24 = vpop.permute.xlu1 %469 }
 0x3c5   : > { %2550 = vmatpush3.msra.mxu1 %v470_v24  ;;  %v364_v24 = vld [vmem:[#allocation7 + $0x4] sm:$0xf] }
 0x3c6   : > { %2554 = vmatprep.subr.mxu1 %v2980_v1 }
 0x3c8   : > { %v626_v28 = vpop.permute.xlu1 %625 }
 0x3cb   : > { %v2784_v25 = vpop.eup %2783 }
 0x3cc   : > { %v468_v26 = vmul.f32 %v2784_v25, %v2782_v21  ;;  %v624_v29 = vpop.permute.xlu1 %623 }
 0x3ce   : > { %2552 = vmatmul.mubr.msk.f32.vlgmr.msra.gmra.mrb[2].mxu1 %vm457_vm3, %v468_v26 }
 0x3cf   : > { %2555 = vmatpush3.msk.msra.mxu1 %vm548_vm4, %v362_v27  ;;  %2556 = vmatprep.mubr.msk.f32.mxu1 %vm2979_vm0, %v2980_v1 }
 0x3d0   : > { %2559 = vmatprep.subr.mxu1 %v2980_v1  ;;  %v868_v32 = vpop.permute.xlu1 %867 }
 0x3d4   : > { %v866_v33 = vpop.permute.xlu1 %865 }
 0x4a1   : > { %v541_v30 = vpop.f32.mrb[2].mxu1 }
 0x4a2   : > { %v2553_v31 = vpop.f32.mrb[3].mxu1  ;;  %2557 = vmatmul.mubr.msk.f32.vlgmr.msra.gmra.mrb[4].mxu1 %vm381_vm2, %v541_v30 }
 0x4a3   : > { %2560 = vmatpush3.xpose.msk.msra.mxu1 %vm381_vm2, %v626_v28  ;;  %2561 = vmatprep.mubr.msk.f32.mxu1 %vm2979_vm0, %v2980_v1 }
 0x4a4   : > { %2574 = vmatprep.subr.mxu1 %v2980_v1 }
 0x4a6   : > { %2562 = vmatmul.mubr.msk.f32.vlgmr.msra.gmra.mrb[6].mxu1 %vm381_vm2, %v624_v29 }
 0x4a7   : > { %2575 = vmatpush3.xpose.msk.msra.mxu1 %vm381_vm2, %v868_v32  ;;  %2576 = vmatprep.mubr.msk.f32.mxu1 %vm2979_vm0, %v2980_v1 }
 0x4a8   : > { %2579 = vmatprep.subr.mxu1 %v2980_v1 }
 0x4aa   : > { %2577 = vmatmul.mubr.msk.f32.vlgmr.msra.gmra.mrb[8].mxu1 %vm381_vm2, %v866_v33 }
 0x4ab   : > { %2581 = vmatprep.mubr.msk.f32.mxu1 %vm2979_vm0, %v2980_v1 }
 0x575   : > { %v3268_v34 = vpop.f32.mrb[4].mxu1 }
 0x576   : > { %v2558_v35 = vpop.f32.mrb[5].mxu1 }
 0x579   : > { %v3270_v36 = vpop.f32.mrb[6].mxu1 }
 0x57a   : > { %v2563_v37 = vpop.f32.mrb[7].mxu1  ;;  %v701_v61 = vsel %vm457_vm3, %v3270_v36, -inf }
 0x57d   : > { %v939_v38 = vpop.f32.mrb[8].mxu1 }
 0x57e   : > { %v2578_v39 = vpop.f32.mrb[9].mxu1  ;;  %v943_v40 = vsel %vm457_vm3, %v939_v38, -inf }
 0x57f   : > { %944 = vmax.xlane.f32.xlu0 %v943_v40 }
 0x595   : > { %954 = vrot.lane.b32.xlu0 %v3230_v11, %s2987_s29  ;;  %s3001_s29 = smov 44  }
 0x599   : > { %1109 = vrot.lane.b32.xlu0 %v3230_v11, %s2988_s8  ;;  %s3002_s8 = smov 40  }
 0x59d   : > { %1107 = vrot.lane.b32.xlu0 %v3235_v14, %s2989_s9  ;;  %s3003_s9 = smov 36  }
 0x5a1   : > { %1351 = vrot.lane.b32.xlu0 %v3230_v11, %s2990_s11 }
 0x5a5   : > { %1349 = vrot.lane.b32.xlu0 %v3235_v14, %s2991_s17 }
 0x5a9   : > { %1593 = vrot.lane.b32.xlu0 %v3230_v11, %s2992_s23  ;;  %s2477_s23 = sshll.u32 %s3056_s22, 7  ;;  %s2319_s22 = scalar_lea.sflag [#allocation4], %s3204_s14 }
 0x60c   : > { %v945_v41 = vpop.xlane.xlu0 %944 }
 0x60d   : > { %v946_v42 = vsub.f32 %v939_v38, %v945_v41  ;;  %v366_v38 = vld [vmem:[#allocation7 + $0x8] sm:$0xf] }
 0x60f   : > { %v947_v43 = vmul.f32 1.442695, %v946_v42 }
 0x610   : > { %v955_v44 = vpop.permute.xlu0 %954 }
 0x611   : > { %2785 = vpow2.f32 %v947_v43  ;;  %2580 = vmatpush3.msra.mxu1 %v955_v44 }
 0x612   : > { %2589 = vmatprep.subr.mxu1 %v2980_v1 }
 0x614   : > { %v1110_v48 = vpop.permute.xlu0 %1109 }
 0x618   : > { %v1108_v49 = vpop.permute.xlu0 %1107 }
 0x61b   : > { %v2786_v45 = vpop.eup %2785 }
 0x61c   : > { %v949_v46 = vsel %vm457_vm3, %v2786_v45, 0.0  ;;  %v1352_v52 = vpop.permute.xlu0 %1351 }
 0x61d   : > { %950 = vadd.xlane.f32.xlu1 %v949_v46 }
 0x620   : > { %v1350_v53 = vpop.permute.xlu0 %1349 }
 0x624   : > { %v1594_v15 = vpop.permute.xlu0 %1593 }
 0x6aa   : > { %v951_v47 = vpop.xlane.xlu1 %950 }
 0x6ab   : > { %2787 = vrcp.f32 %v951_v47 }
 0x6b5   : > { %v2788_v50 = vpop.eup %2787 }
 0x6b6   : > { %v953_v51 = vmul.f32 %v2788_v50, %v2786_v45 }
 0x6b8   : > { %2582 = vmatmul.mubr.msk.f32.vlgmr.msra.gmra.mrb[10].mxu1 %vm457_vm3, %v953_v51 }
 0x6b9   : > { %2590 = vmatpush3.xpose.msk.msra.mxu1 %vm381_vm2, %v1110_v48  ;;  %2591 = vmatprep.mubr.msk.f32.mxu1 %vm2979_vm0, %v2980_v1 }
 0x6ba   : > { %2604 = vmatprep.subr.mxu1 %v2980_v1 }
 0x6bc   : > { %2592 = vmatmul.mubr.msk.f32.vlgmr.msra.gmra.mrb[12].mxu1 %vm381_vm2, %v1108_v49 }
 0x6bd   : > { %2605 = vmatpush3.xpose.msk.msra.mxu1 %vm381_vm2, %v1352_v52  ;;  %2606 = vmatprep.mubr.msk.f32.mxu1 %vm2979_vm0, %v2980_v1 }
 0x6be   : > { %2609 = vmatprep.subr.mxu1 %v2980_v1 }
 0x6c0   : > { %2607 = vmatmul.mubr.msk.f32.vlgmr.msra.gmra.mrb[14].mxu1 %vm381_vm2, %v1350_v53 }
 0x6c1   : > { %2611 = vmatprep.mubr.msk.f32.mxu1 %vm2979_vm0, %v2980_v1 }
 0x78b   : > { %v3294_v54 = vpop.f32.mrb[10].mxu1 }
 0x78c   : > { %v2583_v55 = vpop.f32.mrb[11].mxu1 }
 0x78f   : > { %v3296_v56 = vpop.f32.mrb[12].mxu1 }
 0x790   : > { %v2593_v57 = vpop.f32.mrb[13].mxu1  ;;  %v1185_v62 = vsel %vm457_vm3, %v3296_v56, -inf }
 0x791   : > { %v368_v57 = vld [vmem:[#allocation7 + $0xc] sm:$0xf] }
 0x793   : > { %v1423_v58 = vpop.f32.mrb[14].mxu1 }
 0x794   : > { %v2608_v59 = vpop.f32.mrb[15].mxu1  ;;  %v1427_v60 = vsel %vm457_vm3, %v1423_v58, -inf }
 0x795   : > { %1428 = vmax.xlane.f32.xlu1 %v1427_v60 }
 0x7a6   : > { %1438 = vrot.lane.b32.xlu1 %v3230_v11, %s2993_s24  ;;  %s268_s24 = scalar_lea.vmem [#allocation8], %s2429_s15 }
 0x7ca   : > { %702 = vmax.xlane.f32.xlu1 %v701_v61 }
 0x7db   : > { %1835 = vrot.lane.b32.xlu1 %v3230_v11, %s2994_s26  ;;  %s2332_s26 = sshll.u32 %s268_s24, 4  ;;  %s3409_s26 = int_to_ptr.vmem [resolvable:$true] %s2332_s26 }
 0x7dc   : > { %s2899_s15 = scalar_lea.vmem %s3409_s26, 128 }
 0x7dd   : > { %p2900_p11 = scmp.ne.s32.totalorder %s3409_s26, %s2899_s15 }
 0x7df   : > { %712 = vrot.lane.b32.xlu1 %v3230_v11, %s2995_s10  ;;  %p2901_p1 = pnand %p2900_p11, %p3471_p0 }
 0x7e1   : > { %p2902_p3 = pneg %p2901_p1 }
 0x803   : > { %1186 = vmax.xlane.f32.xlu1 %v1185_v62 }
 0x822   : > { %v1429_v63 = vpop.xlane.xlu1 %1428 }
 0x823   : > { %v1430_v0 = vsub.f32 %v1423_v58, %v1429_v63  ;;  %v370_v63 = vld [vmem:[#allocation7 + $0x10] sm:$0xf] }
 0x825   : > { %v1431_v2 = vmul.f32 1.442695, %v1430_v0 }
 0x826   : > { %v1439_v3 = vpop.permute.xlu1 %1438 }
 0x827   : > { %2789 = vpow2.f32 %v1431_v2  ;;  %2610 = vmatpush3.msra.mxu1 %v1439_v3 }
 0x828   : > { %2619 = vmatprep.subr.mxu1 %v2980_v1 }
 0x831   : > { %v2790_v4 = vpop.eup %2789 }
 0x832   : > { %v1433_v5 = vsel %vm457_vm3, %v2790_v4, 0.0 }
 0x833   : > { %1434 = vadd.xlane.f32.xlu0 %v1433_v5 }
 0x849   : > { %1591 = vrot.lane.b32.xlu0 %v3235_v14, %s2996_s28 }
 0x84d   : > { %1833 = vrot.lane.b32.xlu0 %v3235_v14, %s2997_s12  ;;  %s3407_s12 = scalar_lea.hbm %s3457_s5, %s2477_s23 }
 0x857   : > { %v703_v6 = vpop.xlane.xlu1 %702 }
 0x858   : > { %v704_v7 = vsub.f32 %v3270_v36, %v703_v6  ;;  %v372_v6 = vld [vmem:[#allocation7 + $0x14] sm:$0xf] }
 0x85a   : > { %v705_v8 = vmul.f32 1.442695, %v704_v7 }
 0x85b   : > { %v1836_v9 = vpop.permute.xlu1 %1835 }
 0x85c   : > { %2791 = vpow2.f32 %v705_v8 }
 0x85f   : > { %v713_v10 = vpop.permute.xlu1 %712 }
 0x860   : > { %2565 = vmatpush3.msra.mxu0 %v713_v10 }
 0x861   : > { %2569 = vmatprep.subr.mxu0 %v2980_v1 }
 0x866   : > { %v2792_v12 = vpop.eup %2791 }
 0x867   : > { %v707_v13 = vsel %vm457_vm3, %v2792_v12, 0.0 }
 0x86c   : > { %708 = vadd.xlane.f32.xlu0 %v707_v13  ;;  %v374_v13 = vld [vmem:[#allocation7 + $0x18] sm:$0xf] }
 0x890   : > { %v1187_v25 = vpop.xlane.xlu1 %1186 }
 0x891   : > { %v1188_v26 = vsub.f32 %v3296_v56, %v1187_v25 }
 0x893   : > { %v1189_v27 = vmul.f32 1.442695, %v1188_v26  ;;  %v376_v26 = vld [vmem:[#allocation7 + $0x1c] sm:$0xf] }
 0x8c0   : > { %v1435_v16 = vpop.xlane.xlu0 %1434 }
 0x8c1   : > { %2793 = vrcp.f32 %v1435_v16 }
 0x8c4   : > { %v1592_v19 = vpop.permute.xlu0 %1591 }
 0x8c8   : > { %v1834_v20 = vpop.permute.xlu0 %1833 }
 0x8cb   : > { %v2794_v17 = vpop.eup %2793 }
 0x8cc   : > { %v1437_v18 = vmul.f32 %v2794_v17, %v2790_v4 }
 0x8ce   : > { %2612 = vmatmul.mubr.msk.f32.vlgmr.msra.gmra.mrb[16].mxu1 %vm457_vm3, %v1437_v18 }
 0x8cf   : > { %2620 = vmatpush3.xpose.msk.msra.mxu1 %vm381_vm2, %v1594_v15  ;;  %2621 = vmatprep.mubr.msk.f32.mxu1 %vm2979_vm0, %v2980_v1 }
 0x8d0   : > { %2634 = vmatprep.subr.mxu1 %v2980_v1 }
 0x8d2   : > { %2622 = vmatmul.mubr.msk.f32.vlgmr.msra.gmra.mrb[18].mxu1 %vm381_vm2, %v1592_v19 }
 0x8d3   : > { %2635 = vmatpush3.xpose.msk.msra.mxu1 %vm381_vm2, %v1836_v9  ;;  %2636 = vmatprep.mubr.msk.f32.mxu1 %vm2979_vm0, %v2980_v1 }
 0x8d4   : > { %2639 = vmatprep.subr.mxu1 %v2980_v1 }
 0x8d6   : > { %2637 = vmatmul.mubr.msk.f32.vlgmr.msra.gmra.mrb[20].mxu1 %vm381_vm2, %v1834_v20 }
 0x8d7   : > { %2641 = vmatprep.mubr.msk.f32.mxu1 %vm2979_vm0, %v2980_v1 }
 0x8f9   : > { %v709_v21 = vpop.xlane.xlu0 %708 }
 0x8fa   : > { %2795 = vrcp.f32 %v709_v21 }
 0x8fb   : > { %2797 = vpow2.f32 %v1189_v27 }
 0x904   : > { %v2796_v22 = vpop.eup %2795 }
 0x905   : > { %v711_v23 = vmul.f32 %v2796_v22, %v2792_v12  ;;  %v2798_v36 = vpop.eup %2797 }
 0x906   : > { %v1191_v37 = vsel %vm457_vm3, %v2798_v36, 0.0 }
 0x907   : > { %2567 = vmatmul.mubr.msk.f32.vlgmr.msra.gmra.mrb[2].mxu0 %vm457_vm3, %v711_v23 }
 0x908   : > { %2571 = vmatprep.mubr.msk.f32.mxu0 %vm2979_vm0, %v2980_v1  ;;  %2570 = vmatpush3.msk.msra.mxu0 %vm548_vm4, %v364_v24 }
 0x909   : > { %2584 = vmatprep.subr.mxu0 %v2980_v1 }
 0x9a1   : > { %v3332_v28 = vpop.f32.mrb[16].mxu1 }
 0x9a2   : > { %v2613_v29 = vpop.f32.mrb[17].mxu1 }
 0x9a5   : > { %v1665_v30 = vpop.f32.mrb[18].mxu1 }
 0x9a6   : > { %v2623_v31 = vpop.f32.mrb[19].mxu1 }
 0x9a9   : > { %v1907_v32 = vpop.f32.mrb[20].mxu1 }
 0x9aa   : > { %v2638_v33 = vpop.f32.mrb[21].mxu1  ;;  %v1911_v35 = vsel %vm457_vm3, %v1907_v32, -inf }
 0x9ab   : > { %1912 = vmax.xlane.f32.xlu0 %v1911_v35 }
 0x9af   : > { %1192 = vadd.xlane.f32.xlu0 %v1191_v37 }
 0x9c5   : > { %1196 = vrot.lane.b32.xlu0 %v3230_v11, %s2998_s13  ;;  %s3004_s13 = smov [#allocation8]  }
 0x9c9   : > { %2077 = vrot.lane.b32.xlu0 %v3230_v11, %s2999_s7  ;;  %s2903_s7 = sshll.u32 %s3004_s13, 4  ;;  %s2904_s7 = int_to_ptr.vmem [resolvable:$false] %s2903_s7 }
 0x9ca   : > { %p2906_p5 = scmp.lt.s32.totalorder %s3409_s26, %s2904_s7 }
 0x9cd   : > { %2075 = vrot.lane.b32.xlu0 %v3235_v14, %s3000_s6  ;;  %v1669_v14 = vsel %vm457_vm3, %v1665_v30, -inf  ;;  %s2905_s6 = scalar_lea.vmem %s2904_s7, 256 }
 0x9ce   : > { %p2907_p9 = scmp.lt.s32.totalorder %s2905_s6, %s2899_s15 }
 0x9d0   : > { %p2908_p12 = por %p2907_p9, %p2906_p5 }
 0x9d2   : > { %p2909_p2 = pnand %p2908_p12, %p2902_p3 }
 0x9da   : > { %v784_v39 = vpop.f32.mrb[2].mxu0 }
 0x9db   : > { %v2568_v40 = vpop.f32.mrb[3].mxu0  ;;  %2572 = vmatmul.mubr.msk.f32.vlgmr.msra.gmra.mrb[4].mxu0 %vm381_vm2, %v784_v39 }
 0x9dc   : > { %2585 = vmatpush3.msk.msra.mxu0 %vm548_vm4, %v366_v38  ;;  %2586 = vmatprep.mubr.msk.f32.mxu0 %vm2979_vm0, %v2980_v1 }
 0x9dd   : > { %2594 = vmatprep.subr.mxu0 %v2980_v1 }
 0x9e3   : > { %2587 = vmatmul.mubr.msk.f32.vlgmr.msra.gmra.mrb[4].mxu0 %vm381_vm2, %v3294_v54 }
 0x9e4   : > { %2596 = vmatprep.mubr.msk.f32.mxu0 %vm2979_vm0, %v2980_v1 }
 0x9ec   : > { %1670 = vmax.xlane.f32.xlu0 %v1669_v14 }
 0xa02   : > { %1680 = vrot.lane.b32.xlu0 %v3230_v11, %s3001_s29 }
 0xa38   : > { %v1913_v41 = vpop.xlane.xlu0 %1912 }
 0xa39   : > { %v1914_v42 = vsub.f32 %v1907_v32, %v1913_v41 }
 0xa3b   : > { %v1915_v43 = vmul.f32 1.442695, %v1914_v42 }
 0xa3c   : > { %v1193_v44 = vpop.xlane.xlu0 %1192 }
 0xa3d   : > { %2799 = vpow2.f32 %v1915_v43 }
 0xa3e   : > { %2801 = vrcp.f32 %v1193_v44 }
 0xa40   : > { %v1197_v45 = vpop.permute.xlu0 %1196 }
 0xa41   : > { %2595 = vmatpush3.msra.mxu0 %v1197_v45 }
 0xa42   : > { %2599 = vmatprep.subr.mxu0 %v2980_v1 }
 0xa44   : > { %v2078_v50 = vpop.permute.xlu0 %2077 }
 0xa47   : > { %v2800_v46 = vpop.eup %2799 }
 0xa48   : > { %v2802_v47 = vpop.eup %2801  ;;  %v1917_v48 = vsel %vm457_vm3, %v2800_v46, 0.0  ;;  %v2076_v51 = vpop.permute.xlu0 %2075 }
 0xa49   : > { %v1195_v49 = vmul.f32 %v2802_v47, %v2798_v36  ;;  %1918 = vadd.xlane.f32.xlu1 %v1917_v48 }
 0xa4b   : > { %2597 = vmatmul.mubr.msk.f32.vlgmr.msra.gmra.mrb[6].mxu0 %vm457_vm3, %v1195_v49 }
 0xa4c   : > { %2601 = vmatprep.mubr.msk.f32.mxu0 %vm2979_vm0, %v2980_v1  ;;  %2600 = vmatpush3.msk.msra.mxu0 %vm548_vm4, %v368_v57 }
 0xa4d   : > { %2614 = vmatprep.subr.mxu0 %v2980_v1 }
 0xa5a   : > { %1922 = vrot.lane.b32.xlu1 %v3230_v11, %s3002_s8 }
 0xa79   : > { %v1671_v52 = vpop.xlane.xlu0 %1670 }
 0xa7a   : > { %v1672_v53 = vsub.f32 %v1665_v30, %v1671_v52 }
 0xa7c   : > { %v1673_v54 = vmul.f32 1.442695, %v1672_v53 }
 0xa7d   : > { %v1681_v4 = vpop.permute.xlu0 %1680 }
 0xa7e   : > { %2803 = vpow2.f32 %v1673_v54 }
 0xa88   : > { %v2804_v55 = vpop.eup %2803 }
 0xa89   : > { %v1675_v56 = vsel %vm457_vm3, %v2804_v55, 0.0 }
 0xa8a   : > { %1676 = vadd.xlane.f32.xlu1 %v1675_v56 }
 0xad6   : > { %v1919_v58 = vpop.xlane.xlu1 %1918 }
 0xad7   : > { %2805 = vrcp.f32 %v1919_v58 }
 0xada   : > { %v1923_v59 = vpop.permute.xlu1 %1922 }
 0xadb   : > { %2640 = vmatpush3.msra.mxu1 %v1923_v59 }
 0xadc   : > { %2649 = vmatprep.subr.mxu1 %v2980_v1 }
 0xae1   : > { %v2806_v60 = vpop.eup %2805 }
 0xae2   : > { %v1921_v61 = vmul.f32 %v2806_v60, %v2800_v46 }
 0xae4   : > { %2642 = vmatmul.mubr.msk.f32.vlgmr.msra.gmra.mrb[22].mxu1 %vm457_vm3, %v1921_v61 }
 0xae5   : > { %2650 = vmatpush3.xpose.msk.msra.mxu1 %vm381_vm2, %v2078_v50  ;;  %2651 = vmatprep.mubr.msk.f32.mxu1 %vm2979_vm0, %v2980_v1 }
 0xae8   : > { %2652 = vmatmul.mubr.msk.f32.vlgmr.msra.gmra.mrb[24].mxu1 %vm381_vm2, %v2076_v51 }
 0xb17   : > { %v1677_v62 = vpop.xlane.xlu1 %1676 }
 0xb18   : > { %2807 = vrcp.f32 %v1677_v62 }
 0xb1e   : > { %v1268_v0 = vpop.f32.mrb[6].mxu0 }
 0xb1f   : > { %v2598_v2 = vpop.f32.mrb[7].mxu0  ;;  %2602 = vmatmul.mubr.msk.f32.vlgmr.msra.gmra.mrb[4].mxu0 %vm381_vm2, %v1268_v0 }
 0xb20   : > { %2615 = vmatpush3.msk.msra.mxu0 %vm548_vm4, %v370_v63  ;;  %2616 = vmatprep.mubr.msk.f32.mxu0 %vm2979_vm0, %v2980_v1 }
 0xb21   : > { %2624 = vmatprep.subr.mxu0 %v2980_v1 }
 0xb22   : > { %v2808_v3 = vpop.eup %2807 }
 0xb23   : > { %v1679_v5 = vmul.f32 %v2808_v3, %v2804_v55 }
 0xb27   : > { %2617 = vmatmul.mubr.msk.f32.vlgmr.msra.gmra.mrb[4].mxu0 %vm381_vm2, %v3332_v28  ;;  %v2435_v28 = vld [vmem:[%s3456_s4] ss:$0 sm:$0xff] }
 0xb28   : > { %2625 = vmatpush3.msra.mxu0 %v1681_v4  ;;  %2626 = vmatprep.mubr.msk.f32.mxu0 %vm2979_vm0, %v2980_v1  ;;  %v622_v29 = vadd.f32 %v2435_v28, %v3268_v34 }
 0xb29   : > { %2629 = vmatprep.subr.mxu0 %v2980_v1 }
 0xb2b   : > { %2627 = vmatmul.mubr.msk.f32.vlgmr.msra.gmra.mrb[8].mxu0 %vm457_vm3, %v1679_v5 }
 0xb2c   : > { %2631 = vmatprep.mubr.msk.f32.mxu0 %vm2979_vm0, %v2980_v1  ;;  %2630 = vmatpush3.msk.msra.mxu0 %vm548_vm4, %v372_v6 }
 0xb2d   : > { %2644 = vmatprep.subr.mxu0 %v2980_v1 }
 0xbb7   : > { %v1994_v7 = vpop.f32.mrb[22].mxu1 }
 0xbb8   : > { %v2643_v8 = vpop.f32.mrb[23].mxu1 }
 0xbbb   : > { %v2149_v9 = vpop.f32.mrb[24].mxu1 }
 0xbbc   : > { %v2653_v10 = vpop.f32.mrb[25].mxu1  ;;  %v2153_v12 = vsel %vm457_vm3, %v2149_v9, -inf }
 0xbbd   : > { %2154 = vmax.xlane.f32.xlu1 %v2153_v12 }
 0xbfe   : > { %v1752_v15 = vpop.f32.mrb[8].mxu0 }
 0xbff   : > { %v2628_v16 = vpop.f32.mrb[9].mxu0  ;;  %2632 = vmatmul.mubr.msk.f32.vlgmr.msra.gmra.mrb[4].mxu0 %vm381_vm2, %v1752_v15 }
 0xc00   : > { %2645 = vmatpush3.msk.msra.mxu0 %vm548_vm4, %v374_v13  ;;  %2646 = vmatprep.mubr.msk.f32.mxu0 %vm2979_vm0, %v2980_v1 }
 0xc01   : > { %2654 = vmatprep.subr.mxu0 %v2980_v1 }
 0xc07   : > { %2647 = vmatmul.mubr.msk.f32.vlgmr.msra.gmra.mrb[4].mxu0 %vm381_vm2, %v1994_v7 }
 0xc08   : > { %2656 = vmatprep.mubr.msk.f32.mxu0 %vm2979_vm0, %v2980_v1 }
 0xc4a   : > { %v2155_v17 = vpop.xlane.xlu1 %2154 }
 0xc4b   : > { %v2156_v18 = vsub.f32 %v2149_v9, %v2155_v17 }
 0xc4d   : > { %v2157_v19 = vmul.f32 1.442695, %v2156_v18 }
 0xc4f   : > { %2809 = vpow2.f32 %v2157_v19 }
 0xc59   : > { %v2810_v20 = vpop.eup %2809 }
 0xc5a   : > { %v2159_v21 = vsel %vm457_vm3, %v2810_v20, 0.0 }
 0xc5b   : > { %2160 = vadd.xlane.f32.xlu1 %v2159_v21 }
 0xc6c   : > { %2164 = vrot.lane.b32.xlu1 %v3230_v11, %s3003_s9 }
 0xce8   : > { %v2161_v22 = vpop.xlane.xlu1 %2160 }
 0xce9   : > { %2811 = vrcp.f32 %v2161_v22 }
 0xcec   : > { %v2165_v23 = vpop.permute.xlu1 %2164 }
 0xced   : > { %2655 = vmatpush3.msra.mxu0 %v2165_v23 }
 0xcee   : > { %2659 = vmatprep.subr.mxu0 %v2980_v1 }
 0xcf3   : > { %v2812_v24 = vpop.eup %2811 }
 0xcf4   : > { %v2163_v25 = vmul.f32 %v2812_v24, %v2810_v20 }
 0xcf6   : > { %2657 = vmatmul.mubr.msk.f32.vlgmr.msra.gmra.mrb[10].mxu0 %vm457_vm3, %v2163_v25 }
 0xcf7   : > { %2660 = vmatpush3.msk.msra.mxu0 %vm548_vm4, %v376_v26  ;;  %2661 = vmatprep.mubr.msk.f32.mxu0 %vm2979_vm0, %v2980_v1 }
 0xdc9   : > { %v2236_v11 = vpop.f32.mrb[10].mxu0 }
 0xdca   : > { %v2658_v27 = vpop.f32.mrb[11].mxu0  ;;  %2662 = vmatmul.mubr.msk.f32.vlgmr.msra.gmra.mrb[4].mxu0 %vm381_vm2, %v2236_v11 }
 0xe9d   : > { %v2312_v30 = vpop.f32.mrb[4].mxu0 }
 0xe9e   : > { %v2671_v31 = vadd.f32 %v2312_v30, %v622_v29  ;;  %v2663_v32 = vpop.f32.mrb[5].mxu0 }
 0xea0   : > { %2317 = vst.msk [vmem:[%s268_s24] sm:$0xff] %vm281_vm1, %v2671_v31 }
 0xea1   : > { %2912 = shalt.err (!%p2909_p2)
}
 0xea2   : > { %s2913_s14 = scalar_lea.hbm %s3407_s12, 128  ;;  %s2917_s9 = scalar_lea.hbm %s3457_s5, 256 }
 0xea3   : > { %p2914_p13 = scmp.ne.s32.totalorder %s3407_s12, %s2913_s14  ;;  %p2918_p4 = scmp.lt.u32.totalorder %s3407_s12, %s3457_s5 }
 0xea4   : > { %p2919_p7 = scmp.lt.u32.totalorder %s2917_s9, %s2913_s14  ;;  %p2921_p11 = scmp.lt.u32.totalorder %s2913_s14, %s3407_s12 }
 0xea5   : > { %p2915_p6 = pnand %p2914_p13, %p3471_p0 }
 0xea6   : > { %p2920_p8 = por %p2919_p7, %p2918_p4 }
 0xea7   : > { %p2916_p10 = pneg %p2915_p6 }
 0xea8   : > { %p2922_p1 = por %p2921_p11, %p2920_p8 }
 0xeaa   : > { %p2923_p3 = pnand %p2922_p1, %p2916_p10 }
 0xeac   : > { %2926 = shalt.err (!%p2923_p3)
}
 0xead   : > { %2694 = dma.vmem_to_hbm [thread:$0]  (%p3471_p0), %s3409_s26, 128, %s3407_s12, %s2319_s22  }
 0xeae PF: > { %s2344_s23 = sand.u32 1, %s2957_s18   ;;  %p3472_p5 = scmp.ne.s32.totalorder %s3462_s25, 0 }
 0xeaf   : > { %p3473_p9 = scmp.ge.s32.totalorder %s2969_s21, 2  ;;  %s2345_s24 = scalar_lea.sflag [#allocation4], %s2344_s23 }
 0xeb1   : > { %p2708_p12 = pnand %p3473_p9, %p3472_p5 }
 0xeb3   : > { %2952 = dma.done.wait (!%p2708_p12), %s2345_s24, 128  }
 0xeb4   : > { %2954 = vsyncadd (!%p2708_p12), %s2345_s24, 4294967168  ;;  %p19_p2 = scmp.ge.s32.totalorder %s3145_s16, 4   ;;  %s3474_s18 = smov %s2961_s19 }
 0xeb5   : > { %s3475_s19 = smov %s2965_s20  ;;  %s3476_s20 = smov %s3154_s27 }
 0xeb6   : > { %s3477_s21 = smov %s3145_s16  ;;  %21 = sbr.rel (!%p19_p2) target bundleno = 6 (0x6), region = 100 }
 0xebd   :  { %2350 = vsyncpa [#allocation3], 1 }
 0xebe   :  { %2352 = vsyncpa [#allocation3 + $0x1], 1 }
 0xebf   :  { %2353 = vsyncpa [#allocation6], 1 }
 0xec0   :  { %2354 = vsyncpa [#allocation4], 1 }
 0xec1   :  { %2356 = vsyncpa [#allocation4 + $0x1], 1 }

</bundles_post_ra>
